<compile_context>
chip_gen: v6e
topology: v6e:2x2x1
jax: 0.10.0
libtpu: 0.0.40
codegen_flags: <defaults>
</compile_context>

<pallas_src>
import jax
import jax.numpy as jnp
from jax.experimental import pallas as pl
from jax.experimental.pallas import tpu as pltpu

H1 = 64      # inputLayer out features (padded to 128 inside the kernel)
H2 = 128     # fullConnected1 out features
_LANE = 128
_SUBLANE = 8


def _round_up(x, m):
    return ((x + m - 1) // m) * m


def _cdiv(a, b):
    return -(-a // b)


def _actor_kernel(x_ref, w1_ref, b1_ref, w2_ref, b2_ref, w3_ref, b3_ref, o_ref):
    # x_ref: [tb, IN] f32 ; w1/w2/w3: bf16 ; b1/b2/b3: f32 ; o_ref: [tb, OUT] bf16.
    # f32 -> bf16 cast in-register (VPU), so the wrapper never materializes a
    # padded/cast copy of x in HBM.
    x = x_ref[...].astype(jnp.bfloat16)

    # Layer 1: Linear + ReLU (bf16 MXU dot, f32 accumulate / bias / ReLU).
    h1 = jnp.dot(x, w1_ref[...], preferred_element_type=jnp.float32) + b1_ref[...]
    h1 = jnp.maximum(h1, 0.0).astype(jnp.bfloat16)

    # Layer 2: Linear + ReLU.
    h2 = jnp.dot(h1, w2_ref[...], preferred_element_type=jnp.float32) + b2_ref[...]
    h2 = jnp.maximum(h2, 0.0).astype(jnp.bfloat16)

    # Output layer: Linear + tanh (tanh on the EUP, f32), stored as bf16 at the
    # true OUT width -> only real output bytes hit HBM.
    out = jnp.dot(h2, w3_ref[...], preferred_element_type=jnp.float32) + b3_ref[...]
    o_ref[...] = jnp.tanh(out).astype(o_ref.dtype)


def init_actor_params(key, input_space_size, output_space_size):
    """PyTorch-style uniform(-1/sqrt(fan_in), 1/sqrt(fan_in)) init, f32."""
    def linear_init(k, fan_in, fan_out):
        kw, kb = jax.random.split(k)
        bound = 1.0 / jnp.sqrt(fan_in)
        w = jax.random.uniform(kw, (fan_in, fan_out), jnp.float32, -bound, bound)
        b = jax.random.uniform(kb, (1, fan_out), jnp.float32, -bound, bound)
        return w, b

    k1, k2, k3 = jax.random.split(key, 3)
    w1, b1 = linear_init(k1, input_space_size, H1)
    w2, b2 = linear_init(k2, H1, H2)
    w3, b3 = linear_init(k3, H2, output_space_size)
    return {"w1": w1, "b1": b1, "w2": w2, "b2": b2, "w3": w3, "b3": b3}


def prepare_actor_params(params):
    """One-time prep: pad only the 64-wide hidden dim to 128 lanes, cast weights to bf16.

    x's IN dim and the OUT dim stay at their true widths (legal full-extent blocks).
    """
    IN = params["w1"].shape[0]
    h1_pad = _round_up(H1, _LANE)

    w1 = jnp.zeros((IN, h1_pad), jnp.bfloat16)
    w1 = w1.at[:, :H1].set(params["w1"].astype(jnp.bfloat16))
    b1 = jnp.zeros((1, h1_pad), jnp.float32).at[:, :H1].set(params["b1"])

    w2 = jnp.zeros((h1_pad, H2), jnp.bfloat16)
    w2 = w2.at[:H1, :].set(params["w2"].astype(jnp.bfloat16))
    b2 = params["b2"].astype(jnp.float32)

    w3 = params["w3"].astype(jnp.bfloat16)       # (H2, OUT), no lane padding
    b3 = params["b3"].astype(jnp.float32)        # (1, OUT)

    return {"w1": w1, "b1": b1, "w2": w2, "b2": b2, "w3": w3, "b3": b3}


def actor_forward(x, p, *, batch_tile=512):
    """Fused ActorNetwork forward pass.

    x: [B, IN] f32.  p: params from prepare_actor_params.
    Returns [B, OUT] f32 in [-1, 1].  Call under jit so the (optional) row pad and
    the final slice/cast fuse with the surrounding graph.
    """
    B, IN = x.shape
    h1_pad = p["w1"].shape[1]
    OUT = p["w3"].shape[1]

    # Balanced batch tiles: roughly-equal tiles (so B just over a multiple doesn't
    # pad a whole extra tile), multiple of 8 sublanes, and >=2 grid steps whenever
    # possible so both v7x TensorCores get work ("parallel" batch axis).
    n_tiles = max(_cdiv(B, batch_tile), 2)
    tb = _round_up(_cdiv(B, n_tiles), _SUBLANE)
    b_pad = _round_up(B, tb)
    grid = (b_pad // tb,)

    # Only pad batch rows (with zeros) when B isn't already a tile multiple.
    x_p = x if b_pad == B else jnp.pad(x, ((0, b_pad - B), (0, 0)))

    # Advisory cost estimate for XLA scheduling around the custom call.
    w_elems = IN * h1_pad + h1_pad * H2 + H2 * OUT
    cost = pl.CostEstimate(
        flops=2 * b_pad * w_elems,
        transcendentals=b_pad * OUT,
        bytes_accessed=(b_pad * IN * 4 + b_pad * OUT * 2
                        + w_elems * 2 + (h1_pad + H2 + OUT) * 4),
    )

    # Explicit VMEM budget: double-buffered x/out tiles + resident weights/biases
    # + f32 intermediate headroom + compiler scratch.  Tiny vs. v7x's 64 MiB.
    vmem_bytes = (
        2 * tb * IN * 4               # x tiles (f32, double-buffered)
        + 2 * tb * OUT * 2            # out tiles (bf16, double-buffered)
        + 2 * w_elems * 2             # weights (bf16)
        + 2 * (h1_pad + H2 + OUT) * 4 # biases (f32)
        + 4 * tb * H2 * 4             # h1/h2/out f32 intermediates headroom
        + (8 << 20))                  # compiler scratch headroom
    vmem_bytes = int(min(vmem_bytes, 64 << 20))

    # Weights/biases have constant index_maps -> loaded once, resident in VMEM.
    full = lambda shape: pl.BlockSpec(shape, lambda i: (0, 0))

    out_padded = pl.pallas_call(
        _actor_kernel,
        out_shape=jax.ShapeDtypeStruct((b_pad, OUT), jnp.bfloat16),
        grid_spec=pltpu.PrefetchScalarGridSpec(
            num_scalar_prefetch=0,
            grid=grid,
            in_specs=[
                pl.BlockSpec((tb, IN), lambda i: (i, 0)),   # x tile (true IN width)
                full((IN, h1_pad)), full((1, h1_pad)),      # layer 1
                full((h1_pad, H2)), full((1, H2)),          # layer 2
                full((H2, OUT)), full((1, OUT)),            # output layer (true OUT)
            ],
            out_specs=pl.BlockSpec((tb, OUT), lambda i: (i, 0)),
        ),
        compiler_params=pltpu.CompilerParams(
            dimension_semantics=("parallel",),   # batch axis -> megacore on v7x
            vmem_limit_bytes=vmem_bytes,
        ),
        cost_estimate=cost,
    )(x_p, p["w1"], p["b1"], p["w2"], p["b2"], p["w3"], p["b3"])

    # Row slice only (no lane slice needed), cast back to f32 for consumers.
    return out_padded[:B].astype(jnp.float32)


def actor_reference(x, p, compute_dtype=jnp.float32):
    """Pure-JAX reference of the PyTorch forward pass (optionally bf16 dots)."""
    def lin(h, w, b):
        return jnp.dot(h.astype(compute_dtype), w.astype(compute_dtype),
                       preferred_element_type=jnp.float32) + b
    h1 = jnp.maximum(lin(x, p["w1"], p["b1"]), 0.0)
    h2 = jnp.maximum(lin(h1, p["w2"], p["b2"]), 0.0)
    return jnp.tanh(lin(h2, p["w3"], p["b3"]))


if __name__ == "__main__":
    input_space_size = 32   # inputSpaceSize
    output_space_size = 8   # outputSpaceSize
    batch = 8

    key = jax.random.PRNGKey(0)
    k_x, k_p = jax.random.split(key)
    x = jax.random.normal(k_x, (batch, input_space_size), jnp.float32)

    raw_params = init_actor_params(k_p, input_space_size, output_space_size)
    params = prepare_actor_params(raw_params)

    # One jit around pad + pallas_call + slice/cast so no extra dispatches.
    fwd = jax.jit(lambda xx: actor_forward(xx, params))
    out = jax.block_until_ready(fwd(x))

    # Tight check vs. a bf16-dot reference (kernel additionally rounds the final
    # tanh to bf16), loose check vs. the full-f32 reference.
    ref_bf16 = actor_reference(x, raw_params, jnp.bfloat16)
    ref_f32 = actor_reference(x, raw_params, jnp.float32)

    assert out.shape == (batch, output_space_size)
    assert bool(jnp.all(jnp.abs(out) <= 1.0)), "tanh range violated"
    assert jnp.allclose(out, ref_bf16, atol=1e-2, rtol=1e-2), "mismatch vs bf16 reference"
    assert jnp.allclose(out, ref_f32, atol=5e-2, rtol=5e-2), "mismatch vs f32 reference"

    print("KERNEL_OK")
</pallas_src>

<mosaic_0001>
module attributes {stable_mosaic.version = 11 : i64} {
  func.func @_actor_kernel(%arg0: i32, %arg1: memref<8x32xf32, #tpu.memory_space<vmem>>, %arg2: memref<32x128xbf16, #tpu.memory_space<vmem>>, %arg3: memref<1x128xf32, #tpu.memory_space<vmem>>, %arg4: memref<128x128xbf16, #tpu.memory_space<vmem>>, %arg5: memref<1x128xf32, #tpu.memory_space<vmem>>, %arg6: memref<128x8xbf16, #tpu.memory_space<vmem>>, %arg7: memref<1x8xf32, #tpu.memory_space<vmem>>, %arg8: memref<8x8xbf16, #tpu.memory_space<vmem>>) attributes {dimension_semantics = [#tpu.dimension_semantics<parallel>], iteration_bounds = array<i64: 1>, scalar_prefetch = 0 : i64, scratch_operands = 0 : i64, tpu.core_type = #tpu.core_type<tc>, window_params = [{transform_indices = @transform_0, window_bounds = array<i64: 8, 32>}, {pipeline_mode = #tpu.pipeline_mode<synchronous>, transform_indices = @transform_1, window_bounds = array<i64: 32, 128>}, {pipeline_mode = #tpu.pipeline_mode<synchronous>, transform_indices = @transform_2, window_bounds = array<i64: 1, 128>}, {pipeline_mode = #tpu.pipeline_mode<synchronous>, transform_indices = @transform_3, window_bounds = array<i64: 128, 128>}, {pipeline_mode = #tpu.pipeline_mode<synchronous>, transform_indices = @transform_4, window_bounds = array<i64: 1, 128>}, {pipeline_mode = #tpu.pipeline_mode<synchronous>, transform_indices = @transform_5, window_bounds = array<i64: 128, 8>}, {pipeline_mode = #tpu.pipeline_mode<synchronous>, transform_indices = @transform_6, window_bounds = array<i64: 1, 8>}, {transform_indices = @transform_7, window_bounds = array<i64: 8, 8>}]} {
    %c0 = arith.constant 0 : index
    %c0_0 = arith.constant 0 : index
    %0 = vector.load %arg1[%c0, %c0_0] : memref<8x32xf32, #tpu.memory_space<vmem>>, vector<8x32xf32>
    %1 = arith.truncf %0 : vector<8x32xf32> to vector<8x32xbf16>
    %c0_1 = arith.constant 0 : index
    %c0_2 = arith.constant 0 : index
    %2 = vector.load %arg2[%c0_1, %c0_2] : memref<32x128xbf16, #tpu.memory_space<vmem>>, vector<32x128xbf16>
    %cst = arith.constant dense<0.000000e+00> : vector<8x128xf32>
    %3 = tpu.matmul %1, %2, %cst {dimension_numbers = #tpu.dot_dimension_numbers<[1], [0], [0], [1], [0, 0, 1, 1], [], []>} : vector<8x32xbf16>, vector<32x128xbf16>, vector<8x128xf32> -> vector<8x128xf32>
    %c0_3 = arith.constant 0 : index
    %c0_4 = arith.constant 0 : index
    %4 = vector.load %arg3[%c0_3, %c0_4] : memref<1x128xf32, #tpu.memory_space<vmem>>, vector<1x128xf32>
    %5 = vector.broadcast %4 : vector<1x128xf32> to vector<8x128xf32>
    %6 = arith.addf %3, %5 : vector<8x128xf32>
    %cst_5 = arith.constant 0.000000e+00 : f32
    %7 = vector.broadcast %cst_5 : f32 to vector<8x128xf32>
    %8 = arith.maximumf %6, %7 : vector<8x128xf32>
    %9 = arith.truncf %8 : vector<8x128xf32> to vector<8x128xbf16>
    %c0_6 = arith.constant 0 : index
    %c0_7 = arith.constant 0 : index
    %10 = vector.load %arg4[%c0_6, %c0_7] : memref<128x128xbf16, #tpu.memory_space<vmem>>, vector<128x128xbf16>
    %cst_8 = arith.constant dense<0.000000e+00> : vector<8x128xf32>
    %11 = tpu.matmul %9, %10, %cst_8 {dimension_numbers = #tpu.dot_dimension_numbers<[1], [0], [0], [1], [0, 0, 1, 1], [], []>} : vector<8x128xbf16>, vector<128x128xbf16>, vector<8x128xf32> -> vector<8x128xf32>
    %c0_9 = arith.constant 0 : index
    %c0_10 = arith.constant 0 : index
    %12 = vector.load %arg5[%c0_9, %c0_10] : memref<1x128xf32, #tpu.memory_space<vmem>>, vector<1x128xf32>
    %13 = vector.broadcast %12 : vector<1x128xf32> to vector<8x128xf32>
    %14 = arith.addf %11, %13 : vector<8x128xf32>
    %cst_11 = arith.constant 0.000000e+00 : f32
    %15 = vector.broadcast %cst_11 : f32 to vector<8x128xf32>
    %16 = arith.maximumf %14, %15 : vector<8x128xf32>
    %17 = arith.truncf %16 : vector<8x128xf32> to vector<8x128xbf16>
    %c0_12 = arith.constant 0 : index
    %c0_13 = arith.constant 0 : index
    %18 = vector.load %arg6[%c0_12, %c0_13] : memref<128x8xbf16, #tpu.memory_space<vmem>>, vector<128x8xbf16>
    %cst_14 = arith.constant dense<0.000000e+00> : vector<8x8xf32>
    %19 = tpu.matmul %17, %18, %cst_14 {dimension_numbers = #tpu.dot_dimension_numbers<[1], [0], [0], [1], [0, 0, 1, 1], [], []>} : vector<8x128xbf16>, vector<128x8xbf16>, vector<8x8xf32> -> vector<8x8xf32>
    %c0_15 = arith.constant 0 : index
    %c0_16 = arith.constant 0 : index
    %20 = vector.load %arg7[%c0_15, %c0_16] : memref<1x8xf32, #tpu.memory_space<vmem>>, vector<1x8xf32>
    %21 = vector.broadcast %20 : vector<1x8xf32> to vector<8x8xf32>
    %22 = arith.addf %19, %21 : vector<8x8xf32>
    %23 = math.tanh %22 : vector<8x8xf32>
    %24 = arith.truncf %23 : vector<8x8xf32> to vector<8x8xbf16>
    %c0_17 = arith.constant 0 : index
    %c0_18 = arith.constant 0 : index
    %25 = vector.load %arg8[%c0_17, %c0_18] : memref<8x8xbf16, #tpu.memory_space<vmem>>, vector<8x8xbf16>
    tpu.vector_store %arg8[%c0_17, %c0_18], %24 {strides = array<i32>} : memref<8x8xbf16, #tpu.memory_space<vmem>>, vector<8x8xbf16>,
    return
  }
  func.func @transform_0(%arg0: i32) -> (i32, i32) {
    %c0_i32 = arith.constant 0 : i32
    %c0_i32_0 = arith.constant 0 : i32
    return %arg0, %c0_i32 : i32, i32
  }
  func.func @transform_1(%arg0: i32) -> (i32, i32) {
    %c0_i32 = arith.constant 0 : i32
    %c0_i32_0 = arith.constant 0 : i32
    %c0_i32_1 = arith.constant 0 : i32
    return %c0_i32, %c0_i32_0 : i32, i32
  }
  func.func @transform_2(%arg0: i32) -> (i32, i32) {
    %c0_i32 = arith.constant 0 : i32
    %c0_i32_0 = arith.constant 0 : i32
    %c0_i32_1 = arith.constant 0 : i32
    return %c0_i32, %c0_i32_0 : i32, i32
  }
  func.func @transform_3(%arg0: i32) -> (i32, i32) {
    %c0_i32 = arith.constant 0 : i32
    %c0_i32_0 = arith.constant 0 : i32
    %c0_i32_1 = arith.constant 0 : i32
    return %c0_i32, %c0_i32_0 : i32, i32
  }
  func.func @transform_4(%arg0: i32) -> (i32, i32) {
    %c0_i32 = arith.constant 0 : i32
    %c0_i32_0 = arith.constant 0 : i32
    %c0_i32_1 = arith.constant 0 : i32
    return %c0_i32, %c0_i32_0 : i32, i32
  }
  func.func @transform_5(%arg0: i32) -> (i32, i32) {
    %c0_i32 = arith.constant 0 : i32
    %c0_i32_0 = arith.constant 0 : i32
    %c0_i32_1 = arith.constant 0 : i32
    return %c0_i32, %c0_i32_0 : i32, i32
  }
  func.func @transform_6(%arg0: i32) -> (i32, i32) {
    %c0_i32 = arith.constant 0 : i32
    %c0_i32_0 = arith.constant 0 : i32
    %c0_i32_1 = arith.constant 0 : i32
    return %c0_i32, %c0_i32_0 : i32, i32
  }
  func.func @transform_7(%arg0: i32) -> (i32, i32) {
    %c0_i32 = arith.constant 0 : i32
    %c0_i32_0 = arith.constant 0 : i32
    return %arg0, %c0_i32 : i32, i32
  }
}

</mosaic_0001>

<bundles_post_ra>
// kernel: _lambda_.1
= control target key start
LH: loop header
LB: loop body
LE: loop exit
PB: predicated region body
PF: predicated region fallthrough
CT: control target
= control target key end

     0   :  { %12 = vsyncpa [#allocation3], 0  ;;  %s696_s0 = inlined_call_operand.hbm [shape: f32[8,32], index: 0, kind: input, shape index: {}]   ;;  %s697_s1 = inlined_call_operand.hbm [shape: bf16[32,128], index: 1, kind: input, shape index: {}]   ;;  %s698_s2 = inlined_call_operand.vmem [shape: f32[1,128], index: 2, kind: input, shape index: {}]   ;;  %s699_s3 = inlined_call_operand.hbm [shape: bf16[128,128], index: 3, kind: input, shape index: {}]   ;;  %s700_s4 = inlined_call_operand.vmem [shape: f32[1,128], index: 4, kind: input, shape index: {}]   ;;  %s701_s5 = inlined_call_operand.hbm [shape: bf16[128,8], index: 5, kind: input, shape index: {}]   ;;  %s702_s6 = inlined_call_operand.vmem [shape: f32[1,8], index: 6, kind: input, shape index: {}]   ;;  %s703_s7 = inlined_call_operand.vmem [shape: bf16[8,8], index: 7, kind: output, shape index: {}]  }
   0x1   :  { %13 = vsyncpa [#allocation5], 0 }
   0x2   :  { %14 = vsyncpa [#allocation8], 0  ;;  %s591_s24 = smov [#allocation4]  }
   0x3   :  { %s30_s25 = sshll.u32 %s591_s24, 4  ;;  %s31_s25 = int_to_ptr.vmem [resolvable:$true] %s30_s25 }
   0x4   :  { %s513_s26 = scalar_lea.vmem %s31_s25, 256  ;;  %p518_p1 = scmp.lt.s32.totalorder %s31_s25, %s31_s25 }
   0x5   :  { %p514_p0 = scmp.ne.s32.totalorder %s31_s25, %s513_s26  ;;  %p519_p2 = scmp.lt.s32.totalorder %s513_s26, %s513_s26 }
   0x7   :  { %p520_p3 = por %p519_p2, %p518_p1 }
   0x9   :  { %p521_p4 = pnand %p520_p3, %p514_p0 }
   0xb   :  { %524 = shalt.err (!%p521_p4)
}
   0xc   :  { %s592_s27 = smov 64   ;;  %s593_s28 = smov 4  }
   0xd   :  { %36 = dma.hbm_to_vmem [thread:$0]  %s697_s1, 256, %s31_s25, [#allocation5], %s592_s27, %s592_s27, %s593_s28  }
   0xe   :  { %s594_s8 = smov [#allocation2]   ;;  %s595_s10 = smov [#allocation6]  }
   0xf   :  { %s21_s9 = sshll.u32 %s594_s8, 4  ;;  %s44_s11 = sshll.u32 %s595_s10, 4  ;;  %s22_s9 = int_to_ptr.vmem [resolvable:$true] %s21_s9  ;;  %s45_s11 = int_to_ptr.vmem [resolvable:$true] %s44_s11 }
  0x10   :  { %s533_s12 = scalar_lea.vmem %s22_s9, 128  ;;  %p538_p6 = scmp.lt.s32.totalorder %s22_s9, %s22_s9 }
  0x11   :  { %p534_p5 = scmp.ne.s32.totalorder %s22_s9, %s533_s12  ;;  %p539_p7 = scmp.lt.s32.totalorder %s533_s12, %s533_s12 }
  0x13   :  { %p540_p8 = por %p539_p7, %p538_p6 }
  0x15   :  { %p541_p9 = pnand %p540_p8, %p534_p5 }
  0x17   :  { %544 = shalt.err (!%p541_p9)
}
  0x18   :  { %24 = dma.hbm_to_vmem [thread:$0]  %s696_s0, 128, %s22_s9, [#allocation3]  }
  0x19   :  { %s553_s15 = scalar_lea.vmem %s45_s11, 1024  ;;  %p558_p11 = scmp.lt.s32.totalorder %s45_s11, %s45_s11 }
  0x1a   :  { %p554_p10 = scmp.ne.s32.totalorder %s45_s11, %s553_s15  ;;  %p559_p12 = scmp.lt.s32.totalorder %s553_s15, %s553_s15 }
  0x1c   :  { %p560_p13 = por %p559_p12, %p558_p11 }
  0x1e   :  { %p561_p0 = pnand %p560_p13, %p554_p10 }
  0x20   :  { %564 = shalt.err (!%p561_p0)
}
  0x21   :  { %50 = dma.hbm_to_vmem [thread:$0]  %s699_s3, 1024, %s45_s11, [#allocation5], %s592_s27, %s592_s27, %s593_s28  }
  0x22   :  { %s596_s17 = smov [#allocation7]  }
  0x23   :  { %s58_s18 = sshll.u32 %s596_s17, 4  ;;  %s59_s18 = int_to_ptr.vmem [resolvable:$true] %s58_s18 }
  0x24   :  { %s573_s19 = scalar_lea.vmem %s59_s18, 1024  ;;  %p578_p2 = scmp.lt.s32.totalorder %s59_s18, %s59_s18 }
  0x25   :  { %p574_p1 = scmp.ne.s32.totalorder %s59_s18, %s573_s19  ;;  %p579_p3 = scmp.lt.s32.totalorder %s573_s19, %s573_s19 }
  0x27   :  { %p580_p4 = por %p579_p3, %p578_p2 }
  0x29   :  { %p581_p5 = pnand %p580_p4, %p574_p1 }
  0x2b   :  { %584 = shalt.err (!%p581_p5)
}
  0x2c   :  { %64 = dma.hbm_to_vmem [thread:$0]  %s701_s5, 1024, %s59_s18, [#allocation8], %s592_s27, %s592_s27, %s593_s28  }
  0x2d   :  { %585 = dma.done.wait [#allocation3], 128  }
  0x2e   :  { %586 = vsyncadd [#allocation3], 4294967168 }
  0x2f   :  { %587 = dma.done.wait [#allocation5], 1280  }
  0x30   :  { %588 = vsyncadd [#allocation5], 4294966016 }
  0x31   :  { %589 = dma.done.wait [#allocation8], 1024  }
  0x32   :  { %590 = vsyncadd [#allocation8], 4294966272  ;;  %v597_v0 = vmov 0.0   ;;  %vm598_vm0 = vmmov 0   ;;  %v485_v1 = vld [vmem:[#allocation4 + $0x8] sm:$0xff]   ;;  %v486_v2 = vld [vmem:[#allocation4] sm:$0xff]  }
  0x33   :  { %429 = vmatprep.subr.bf16.mxu0 %v597_v0  ;;  %433 = vmatprep.mubr.msk.bf16.mxu0 %vm598_vm0, %v597_v0  ;;  %v80_v3 = vld [vmem:[#allocation2] sm:$0xff]  ;;  %v487_v4 = vld [vmem:[#allocation6 + $0x38] sm:$0xff]   ;;  %v488_v6 = vld [vmem:[#allocation6 + $0x30] sm:$0xff]   ;;  %vm105_vm1 = vcmask 261120   ;;  %vm377_vm2 = vcmask 60416  }
  0x34   :  { %437 = vmatprep.subr.bf16.mxu1 %v597_v0  ;;  %453 = vmatprep.mubr.msk.bf16.mxu1 %vm598_vm0, %v597_v0  ;;  %v81_v5 = vpack.c.bf16 %v80_v3, %v80_v3  ;;  %v489_v7 = vld [vmem:[#allocation6 + $0x28] sm:$0xff]   ;;  %v490_v8 = vld [vmem:[#allocation6 + $0x20] sm:$0xff]   ;;  %v491_v9 = vld [vmem:[#allocation6 + $0x18] sm:$0xff]  }
  0x35   :  { %430 = vmatpush3.bf16.msra.mxu0 %v485_v1  ;;  %438 = vmatpush3.bf16.msra.mxu1 %v487_v4  ;;  %v492_v10 = vld [vmem:[#allocation6 + $0x10] sm:$0xff]   ;;  %v493_v11 = vld [vmem:[#allocation6 + $0x8] sm:$0xff]   ;;  %v494_v12 = vld [vmem:[#allocation6] sm:$0xff]  }
  0x36   :  { %431 = vmatprep.subr.bf16.mxu0 %v597_v0  ;;  %439 = vmatprep.subr.bf16.mxu1 %v597_v0  ;;  %v495_v13 = vld [vmem:[#allocation7 + $0x38] sm:$0xff]   ;;  %v496_v14 = vld [vmem:[#allocation7 + $0x30] sm:$0xff]   ;;  %v497_v15 = vld [vmem:[#allocation7 + $0x28] sm:$0xff]  }
  0x37   :  { %v498_v16 = vld [vmem:[#allocation7 + $0x20] sm:$0xff]   ;;  %v499_v17 = vld [vmem:[#allocation7 + $0x18] sm:$0xff]   ;;  %v500_v18 = vld [vmem:[#allocation7 + $0x10] sm:$0xff]  }
  0x38   :  { %v386_v19 = vld [vmem:[%s698_s2] ss:$0 sm:$0xff]  ;;  %v502_v28 = vld [vmem:[#allocation7] sm:$0xff]  }
  0x39   :  { %432 = vmatpush3.bf16.msra.mxu0 %v486_v2  ;;  %440 = vmatpush3.bf16.msra.mxu1 %v488_v6  ;;  %v501_v27 = vld [vmem:[#allocation7 + $0x8] sm:$0xff]  }
  0x3a   :  { %457 = vmatprep.subr.bf16.mxu0 %v597_v0  ;;  %441 = vmatprep.subr.bf16.mxu1 %v597_v0  ;;  %v390_v29 = vld [vmem:[%s700_s4] ss:$0 sm:$0xff] }
  0x3b   :  { %v399_v37 = vld [vmem:[%s702_s6] ss:$0 sm:$0xff] }
  0x3c   :  { %434 = vmatmul.mubr.msk.bf16.vlgmr.msra.gmra.mxu0 %vm105_vm1, %v81_v5 }
  0x3d   :  { %473 = vmatprep.mubr.msk.bf16.mxu0 %vm598_vm0, %v597_v0  ;;  %442 = vmatpush3.bf16.msra.mxu1 %v489_v7 }
  0x3e   :  { %443 = vmatprep.subr.bf16.mxu1 %v597_v0  ;;  %458 = vmatpush3.bf16.msra.mxu0 %v495_v13 }
  0x3f   :  { %459 = vmatprep.subr.bf16.mxu0 %v597_v0 }
  0x41   :  { %444 = vmatpush3.bf16.msra.mxu1 %v490_v8 }
  0x42   :  { %445 = vmatprep.subr.bf16.mxu1 %v597_v0  ;;  %460 = vmatpush3.bf16.msra.mxu0 %v496_v14 }
  0x43   :  { %461 = vmatprep.subr.bf16.mxu0 %v597_v0 }
  0x45   :  { %446 = vmatpush3.bf16.msra.mxu1 %v491_v9 }
  0x46   :  { %447 = vmatprep.subr.bf16.mxu1 %v597_v0  ;;  %462 = vmatpush3.bf16.msra.mxu0 %v497_v15 }
  0x47   :  { %463 = vmatprep.subr.bf16.mxu0 %v597_v0 }
  0x49   :  { %448 = vmatpush3.bf16.msra.mxu1 %v492_v10 }
  0x4a   :  { %449 = vmatprep.subr.bf16.mxu1 %v597_v0  ;;  %464 = vmatpush3.bf16.msra.mxu0 %v498_v16 }
  0x4b   :  { %465 = vmatprep.subr.bf16.mxu0 %v597_v0 }
  0x4d   :  { %450 = vmatpush3.bf16.msra.mxu1 %v493_v11 }
  0x4e   :  { %451 = vmatprep.subr.bf16.mxu1 %v597_v0  ;;  %466 = vmatpush3.bf16.msra.mxu0 %v499_v17 }
  0x4f   :  { %467 = vmatprep.subr.bf16.mxu0 %v597_v0 }
  0x51   :  { %452 = vmatpush3.bf16.msra.mxu1 %v494_v12 }
  0x52   :  { %468 = vmatpush3.bf16.msra.mxu0 %v500_v18 }
  0x53   :  { %469 = vmatprep.subr.bf16.mxu0 %v597_v0 }
  0x56   :  { %470 = vmatpush3.bf16.msra.mxu0 %v501_v27 }
  0x57   :  { %471 = vmatprep.subr.bf16.mxu0 %v597_v0 }
  0x5a   :  { %472 = vmatpush3.bf16.msra.mxu0 %v502_v28 }
  0xfc   :  { %v143_v20 = vpop.f32.mrf.mxu0 }
  0xfd   :  { %v144_v21 = vadd.f32 %v386_v19, %v143_v20 }
  0xfe   :  { %v435_v22 = vpop.f32.mrf.mxu0 }
  0xff   :  { %v149_v23 = vmax.f32 %v144_v21, 0.0 }
 0x100   :  { %v146_v24 = vpop.f32.mrf.mxu0 }
 0x101   :  { %v150_v25 = vpack.c.bf16 %v149_v23, %v149_v23 }
 0x102   :  { %v436_v26 = vpop.f32.mrf.mxu0 }
 0x103   :  { %454 = vmatmul.mubr.bf16.vlgmr.msra.gmra.mxu1 %v150_v25 }
 0x1c3   :  { %v256_v30 = vpop.f32.mrf.mxu1 }
 0x1c4   :  { %v257_v31 = vadd.f32 %v390_v29, %v256_v30 }
 0x1c5   :  { %v455_v32 = vpop.f32.mrf.mxu1 }
 0x1c6   :  { %v262_v33 = vmax.f32 %v257_v31, 0.0 }
 0x1c7   :  { %v259_v34 = vpop.f32.mrf.mxu1 }
 0x1c8   :  { %v263_v35 = vpack.c.bf16 %v262_v33, %v262_v33 }
 0x1c9   :  { %v456_v36 = vpop.f32.mrf.mxu1 }
 0x1ca   :  { %474 = vmatmul.mubr.bf16.vlgmr.msra.gmra.mxu0 %v263_v35 }
 0x28a   :  { %v369_v38 = vpop.f32.mrf.mxu0 }
 0x28b   :  { %v370_v39 = vadd.f32 %v399_v37, %v369_v38 }
 0x28c   :  { %v475_v40 = vpop.f32.mrf.mxu0 }
 0x28d   :  { %503 = vtanh.f32 %v370_v39 }
 0x28e   :  { %v372_v41 = vpop.f32.mrf.mxu0 }
 0x290   :  { %v476_v42 = vpop.f32.mrf.mxu0 }
 0x29a   :  { %v504_v43 = vpop.eup %503 }
 0x29b   :  { %v376_v44 = vpack.c.bf16 %v504_v43, %v504_v43 }
 0x29d   :  { %378 = vst.msk [vmem:[%s703_s7] sm:$0xf] %vm377_vm2, %v376_v44 }
 0x29e   :  { %383 = vsyncpa [#allocation3], 1 }
 0x29f   :  { %384 = vsyncpa [#allocation5], 1 }
 0x2a0   :  { %385 = vsyncpa [#allocation8], 1 }

</bundles_post_ra>
